<compile_context>
chip_gen: v5e
topology: v5e:2x2
jax: 0.10.0
libtpu: 0.0.40
codegen_flags: <defaults>
</compile_context>

<pallas_src>
import jax
import jax.numpy as jnp
from jax.experimental import pallas as pl
from jax.experimental.pallas import tpu as pltpu

BN_EPS = 1e-5
LEAKY_SLOPE = 0.25
LANE = 128  # per-encoder lane-dense output width

# jnp.maximum(z, slope*z) is only a valid LeakyReLU for 0 <= slope <= 1.
assert 0.0 <= LEAKY_SLOPE <= 1.0


def _little_smile_kernel(xa_ref, xb_ref, wa_ref, wb_ref, gb_ref, o_ref):
    """Both encoders (Linear -> train-mode BN -> LeakyReLU) in one body.

    Encoder A occupies output lanes [0, 128); encoder B occupies [128, 256).
    Weights were pre-placed into disjoint column ranges of zero blocks, so the
    two matmul results live in disjoint halves of one [N, 256] slab and the
    BatchNorm / LeakyReLU run once over the whole slab (per-column stats are
    independent, and the padded columns are exactly 0 because gamma/beta are
    zero-padded there).
    """
    # One small MXU push per encoder, summed into the shared slab.
    # NOTE: the Linear bias is intentionally omitted — under *training-mode*
    # BatchNorm1d it cancels exactly in (y - mean) and leaves the variance
    # unchanged.  Do NOT reuse this kernel with eval-mode running statistics.
    y = (jnp.dot(xa_ref[...], wa_ref[...], preferred_element_type=jnp.float32)
         + jnp.dot(xb_ref[...], wb_ref[...], preferred_element_type=jnp.float32))

    inv_n = 1.0 / float(y.shape[0])
    mean = jnp.sum(y, axis=0, keepdims=True) * inv_n
    centered = y - mean                                                # reused below
    var = jnp.sum(centered * centered, axis=0, keepdims=True) * inv_n  # two-pass, biased

    gamma = gb_ref[0:1, :]   # zero in padded lanes -> scale=0 kills rsqrt(eps) there
    beta = gb_ref[1:2, :]
    scale = gamma * jax.lax.rsqrt(var + BN_EPS)
    z = centered * scale + beta

    # LeakyReLU(0.25) without a cmp+select mask vreg.
    o_ref[...] = jnp.maximum(z, LEAKY_SLOPE * z).astype(o_ref.dtype)


def prepare_params(params, input_dim_a=30, input_dim_b=30, clf_out=10):
    """One-time packing/padding of parameters (hoisted out of the forward path)."""
    assert clf_out <= LANE
    w_a = params["w_a"]
    w_b = params["w_b"]
    assert w_a.shape == (input_dim_a, clf_out) and w_b.shape == (input_dim_b, clf_out)

    # Encoder A -> output lanes [0, clf_out); encoder B -> [LANE, LANE + clf_out).
    wa = jnp.zeros((input_dim_a, 2 * LANE), jnp.float32).at[:, :clf_out].set(w_a)
    wb = jnp.zeros((input_dim_b, 2 * LANE), jnp.float32).at[:, LANE:LANE + clf_out].set(w_b)

    gb = jnp.zeros((2, 2 * LANE), jnp.float32)
    gb = gb.at[0, :clf_out].set(params["gamma_a"])
    gb = gb.at[0, LANE:LANE + clf_out].set(params["gamma_b"])
    gb = gb.at[1, :clf_out].set(params["beta_a"])
    gb = gb.at[1, LANE:LANE + clf_out].set(params["beta_b"])
    # Padded lanes of gamma/beta are zero by construction, which guarantees the
    # padded output columns are exactly 0 (scale = 0 * rsqrt(eps) = 0).

    return {"wa": wa, "wb": wb, "gb": gb, "clf_out": clf_out}


def little_smile_forward(x_a, x_b, prepared):
    """Fused forward for both encoders: a single grid-less pallas_call."""
    n = x_a.shape[0]
    assert x_b.shape[0] == n, "BatchNorm batch dims must match"
    d_out = prepared["clf_out"]

    out = pl.pallas_call(
        _little_smile_kernel,
        out_shape=jax.ShapeDtypeStruct((n, 2 * LANE), jnp.float32),
        in_specs=[
            pl.BlockSpec(memory_space=pltpu.MemorySpace.VMEM),  # x_a  [N, Din_a]
            pl.BlockSpec(memory_space=pltpu.MemorySpace.VMEM),  # x_b  [N, Din_b]
            pl.BlockSpec(memory_space=pltpu.MemorySpace.VMEM),  # W_a  [Din_a, 256]
            pl.BlockSpec(memory_space=pltpu.MemorySpace.VMEM),  # W_b  [Din_b, 256]
            pl.BlockSpec(memory_space=pltpu.MemorySpace.VMEM),  # gamma/beta [2, 256]
        ],
        out_specs=pl.BlockSpec(memory_space=pltpu.MemorySpace.VMEM),
    )(x_a, x_b, prepared["wa"], prepared["wb"], prepared["gb"])

    # Consumers that can take the padded [N, 256] slab should do so; these slices
    # exist only to match the PyTorch (out_a, out_b) contract.
    return out[:, :d_out], out[:, LANE:LANE + d_out]


def init_params(key, input_dim_a=30, input_dim_b=30, clf_out=10):
    """Deterministic synthetic init (Kaiming-uniform-ish linears, BN gamma=1, beta=0)."""
    k1, k2, k3, k4 = jax.random.split(key, 4)
    lim_a = 1.0 / jnp.sqrt(input_dim_a)
    lim_b = 1.0 / jnp.sqrt(input_dim_b)
    return {
        "w_a": jax.random.uniform(k1, (input_dim_a, clf_out), jnp.float32, -lim_a, lim_a),
        "b_a": jax.random.uniform(k2, (clf_out,), jnp.float32, -lim_a, lim_a),
        "gamma_a": jnp.ones((clf_out,), jnp.float32),
        "beta_a": jnp.zeros((clf_out,), jnp.float32),
        "w_b": jax.random.uniform(k3, (input_dim_b, clf_out), jnp.float32, -lim_b, lim_b),
        "b_b": jax.random.uniform(k4, (clf_out,), jnp.float32, -lim_b, lim_b),
        "gamma_b": jnp.ones((clf_out,), jnp.float32),
        "beta_b": jnp.zeros((clf_out,), jnp.float32),
    }


def _reference(x, w, b, gamma, beta):
    """Pure-JAX reference with the *full* PyTorch semantics (bias included)."""
    y = x @ w + b
    mean = y.mean(axis=0, keepdims=True)
    var = ((y - mean) ** 2).mean(axis=0, keepdims=True)
    z = gamma * (y - mean) / jnp.sqrt(var + BN_EPS) + beta
    return jnp.where(z >= 0, z, LEAKY_SLOPE * z)


if __name__ == "__main__":
    key = jax.random.PRNGKey(0)
    kx, kp = jax.random.split(key)

    N = 8
    INPUT_DIM_A = 30
    INPUT_DIM_B = 30
    CLF_OUT = 10

    kxa, kxb = jax.random.split(kx)
    x_a = jax.random.normal(kxa, (N, INPUT_DIM_A), jnp.float32)
    x_b = jax.random.normal(kxb, (N, INPUT_DIM_B), jnp.float32)

    params = init_params(kp, INPUT_DIM_A, INPUT_DIM_B, CLF_OUT)
    prepared = prepare_params(params, INPUT_DIM_A, INPUT_DIM_B, CLF_OUT)  # one-time

    out_a, out_b = little_smile_forward(x_a, x_b, prepared)
    jax.block_until_ready((out_a, out_b))

    # Reference includes the linear bias — verifies that dropping it in-kernel is exact.
    ref_a = _reference(x_a, params["w_a"], params["b_a"], params["gamma_a"], params["beta_a"])
    ref_b = _reference(x_b, params["w_b"], params["b_b"], params["gamma_b"], params["beta_b"])

    assert out_a.shape == (N, CLF_OUT) and out_b.shape == (N, CLF_OUT)
    assert jnp.allclose(out_a, ref_a, atol=1e-4, rtol=1e-4)
    assert jnp.allclose(out_b, ref_b, atol=1e-4, rtol=1e-4)

    print("KERNEL_OK")
</pallas_src>

<mosaic_0001>
module attributes {stable_mosaic.version = 11 : i64} {
  func.func @_little_smile_kernel(%arg0: memref<8x30xf32, #tpu.memory_space<vmem>>, %arg1: memref<8x30xf32, #tpu.memory_space<vmem>>, %arg2: memref<30x256xf32, #tpu.memory_space<vmem>>, %arg3: memref<30x256xf32, #tpu.memory_space<vmem>>, %arg4: memref<2x256xf32, #tpu.memory_space<vmem>>, %arg5: memref<8x256xf32, #tpu.memory_space<vmem>>) attributes {dimension_semantics = [], scalar_prefetch = 0 : i64, scratch_operands = 0 : i64, tpu.core_type = #tpu.core_type<tc>} {
    %c0 = arith.constant 0 : index
    %c0_0 = arith.constant 0 : index
    %0 = vector.load %arg0[%c0, %c0_0] : memref<8x30xf32, #tpu.memory_space<vmem>>, vector<8x30xf32>
    %c0_1 = arith.constant 0 : index
    %c0_2 = arith.constant 0 : index
    %1 = vector.load %arg2[%c0_1, %c0_2] : memref<30x256xf32, #tpu.memory_space<vmem>>, vector<30x256xf32>
    %cst = arith.constant dense<0.000000e+00> : vector<8x256xf32>
    %2 = tpu.matmul %0, %1, %cst {dimension_numbers = #tpu.dot_dimension_numbers<[1], [0], [0], [1], [0, 0, 1, 1], [], []>} : vector<8x30xf32>, vector<30x256xf32>, vector<8x256xf32> -> vector<8x256xf32>
    %c0_3 = arith.constant 0 : index
    %c0_4 = arith.constant 0 : index
    %3 = vector.load %arg1[%c0_3, %c0_4] : memref<8x30xf32, #tpu.memory_space<vmem>>, vector<8x30xf32>
    %c0_5 = arith.constant 0 : index
    %c0_6 = arith.constant 0 : index
    %4 = vector.load %arg3[%c0_5, %c0_6] : memref<30x256xf32, #tpu.memory_space<vmem>>, vector<30x256xf32>
    %cst_7 = arith.constant dense<0.000000e+00> : vector<8x256xf32>
    %5 = tpu.matmul %3, %4, %cst_7 {dimension_numbers = #tpu.dot_dimension_numbers<[1], [0], [0], [1], [0, 0, 1, 1], [], []>} : vector<8x30xf32>, vector<30x256xf32>, vector<8x256xf32> -> vector<8x256xf32>
    %6 = arith.addf %2, %5 : vector<8x256xf32>
    %cst_8 = arith.constant dense<0.000000e+00> : vector<256xf32>
    %7 = vector.multi_reduction <add>, %6, %cst_8 [0] : vector<8x256xf32> to vector<256xf32>
    %8 = vector.shape_cast %7 : vector<256xf32> to vector<1x256xf32>
    %cst_9 = arith.constant 1.250000e-01 : f32
    %9 = vector.broadcast %cst_9 : f32 to vector<1x256xf32>
    %10 = arith.mulf %8, %9 : vector<1x256xf32>
    %11 = vector.broadcast %10 : vector<1x256xf32> to vector<8x256xf32>
    %12 = arith.subf %6, %11 : vector<8x256xf32>
    %13 = arith.mulf %12, %12 : vector<8x256xf32>
    %cst_10 = arith.constant dense<0.000000e+00> : vector<256xf32>
    %14 = vector.multi_reduction <add>, %13, %cst_10 [0] : vector<8x256xf32> to vector<256xf32>
    %15 = vector.shape_cast %14 : vector<256xf32> to vector<1x256xf32>
    %cst_11 = arith.constant 1.250000e-01 : f32
    %16 = vector.broadcast %cst_11 : f32 to vector<1x256xf32>
    %17 = arith.mulf %15, %16 : vector<1x256xf32>
    %c0_12 = arith.constant 0 : index
    %c0_13 = arith.constant 0 : index
    %18 = vector.load %arg4[%c0_12, %c0_13] : memref<2x256xf32, #tpu.memory_space<vmem>>, vector<1x256xf32>
    %c1 = arith.constant 1 : index
    %c0_14 = arith.constant 0 : index
    %19 = vector.load %arg4[%c1, %c0_14] : memref<2x256xf32, #tpu.memory_space<vmem>>, vector<1x256xf32>
    %cst_15 = arith.constant 9.99999974E-6 : f32
    %20 = vector.broadcast %cst_15 : f32 to vector<1x256xf32>
    %21 = arith.addf %17, %20 : vector<1x256xf32>
    %22 = math.rsqrt %21 : vector<1x256xf32>
    %23 = arith.mulf %18, %22 : vector<1x256xf32>
    %24 = vector.broadcast %23 : vector<1x256xf32> to vector<8x256xf32>
    %25 = arith.mulf %12, %24 : vector<8x256xf32>
    %26 = vector.broadcast %19 : vector<1x256xf32> to vector<8x256xf32>
    %27 = arith.addf %25, %26 : vector<8x256xf32>
    %cst_16 = arith.constant 2.500000e-01 : f32
    %28 = vector.broadcast %cst_16 : f32 to vector<8x256xf32>
    %29 = arith.mulf %28, %27 : vector<8x256xf32>
    %30 = arith.maximumf %27, %29 : vector<8x256xf32>
    %c0_17 = arith.constant 0 : index
    %c0_18 = arith.constant 0 : index
    %31 = vector.load %arg5[%c0_17, %c0_18] : memref<8x256xf32, #tpu.memory_space<vmem>>, vector<8x256xf32>
    tpu.vector_store %arg5[%c0_17, %c0_18], %30 {strides = array<i32>} : memref<8x256xf32, #tpu.memory_space<vmem>>, vector<8x256xf32>,
    return
  }
}

</mosaic_0001>

<bundles_post_ra>
// kernel: tpu_custom_call.1
= control target key start
LH: loop header
LB: loop body
LE: loop exit
PB: predicated region body
PF: predicated region fallthrough
CT: control target
= control target key end

     0   :  { %10 = vsyncpa [#allocation3], 0  ;;  %s546_s0 = inlined_call_operand.hbm [shape: f32[8,30], index: 0, kind: input, shape index: {}]   ;;  %s547_s1 = inlined_call_operand.hbm [shape: f32[8,30], index: 1, kind: input, shape index: {}]   ;;  %s548_s2 = inlined_call_operand.hbm [shape: f32[30,256], index: 2, kind: input, shape index: {}]   ;;  %s549_s3 = inlined_call_operand.hbm [shape: f32[30,256], index: 3, kind: input, shape index: {}]   ;;  %s550_s4 = inlined_call_operand.hbm [shape: f32[2,256], index: 4, kind: input, shape index: {}]   ;;  %s551_s5 = inlined_call_operand.hbm [shape: f32[8,256], index: 5, kind: output, shape index: {}]  }
   0x1   :  { %11 = vsyncpa [#allocation6], 0 }
   0x2   :  { %12 = vsyncpa [#allocation9], 0  ;;  %s30_s20 = sshll.u32 %s547_s1, 4  ;;  %s31_s20 = int_to_ptr.hbm [resolvable:$true] %s30_s20 }
   0x3   :  { %13 = vsyncpa [#allocation4], 0  ;;  %s486_s21 = smov [#allocation5]   ;;  %s53_s25 = sshll.u32 %s549_s3, 4  ;;  %s54_s25 = int_to_ptr.hbm [resolvable:$true] %s53_s25 }
   0x4   :  { %s32_s22 = sshll.u32 %s486_s21, 4  ;;  %s487_s26 = smov [#allocation8]   ;;  %s33_s22 = int_to_ptr.vmem [resolvable:$true] %s32_s22 }
   0x5   :  { %35 = dma.hbm_to_vmem [thread:$0]  %s31_s20, 128, %s33_s22, [#allocation6]  }
   0x6   :  { %s55_s27 = sshll.u32 %s487_s26, 4  ;;  %s19_s30 = sshll.u32 %s546_s0, 4  ;;  %s56_s27 = int_to_ptr.vmem [resolvable:$true] %s55_s27  ;;  %s20_s30 = int_to_ptr.hbm [resolvable:$true] %s19_s30 }
   0x7   :  { %s488_s1 = smov 256   ;;  %s489_s6 = smov 16  }
   0x8   :  { %61 = dma.hbm_to_vmem [thread:$0]  %s54_s25, 1024, %s56_s27, [#allocation9], %s488_s1, %s488_s1, %s489_s6  }
   0x9   :  { %s40_s9 = sshll.u32 %s548_s2, 4  ;;  %s490_s10 = smov [#allocation2]   ;;  %s41_s9 = int_to_ptr.hbm [resolvable:$true] %s40_s9 }
   0xa   :  { %s21_s11 = sshll.u32 %s490_s10, 4  ;;  %s491_s3 = smov [#allocation7]   ;;  %s22_s11 = int_to_ptr.vmem [resolvable:$true] %s21_s11 }
   0xb   :  { %24 = dma.hbm_to_vmem [thread:$0]  %s20_s30, 128, %s22_s11, [#allocation3]  }
   0xc   :  { %s42_s12 = sshll.u32 %s491_s3, 4  ;;  %s67_s0 = sshll.u32 %s550_s4, 4  ;;  %s43_s12 = int_to_ptr.vmem [resolvable:$true] %s42_s12  ;;  %s68_s0 = int_to_ptr.hbm [resolvable:$true] %s67_s0 }
   0xd   :  { %48 = dma.hbm_to_vmem [thread:$0]  %s41_s9, 1024, %s43_s12, [#allocation6], %s488_s1, %s488_s1, %s489_s6  }
   0xe   :  { %s492_s15 = smov [#allocation10]  }
   0xf   :  { %s69_s16 = sshll.u32 %s492_s15, 4  ;;  %s70_s16 = int_to_ptr.vmem [resolvable:$true] %s69_s16 }
  0x10   :  { %72 = dma.hbm_to_vmem [thread:$0]  %s68_s0, 64, %s70_s16, [#allocation9]  }
  0x11   :  { %478 = dma.done.wait [#allocation3], 128  }
  0x12   :  { %479 = vsyncadd [#allocation3], 4294967168 }
  0x13   :  { %480 = dma.done.wait [#allocation6], 1152  }
  0x14   :  { %481 = vsyncadd [#allocation6], 4294966144 }
  0x15   :  { %482 = dma.done.wait [#allocation9], 1088  }
  0x16   :  { %483 = vsyncadd [#allocation9], 4294966208  ;;  %vm115_vm0 = vcmask 1045504   ;;  %v100_v0 = vld [vmem:[#allocation7 + $0x30] sm:$0x3f]  ;;  %v98_v2 = vld [vmem:[#allocation7 + $0x20] sm:$0xff] }
  0x17   :  { %v101_v1 = vld [vmem:[#allocation7 + $0x38] sm:$0x3f]  ;;  %318 = vmatpush.msk.msra.mxu2 %vm115_vm0, %v100_v0  ;;  %v99_v3 = vld [vmem:[#allocation7 + $0x28] sm:$0xff]  ;;  %v96_v4 = vld [vmem:[#allocation7 + $0x10] sm:$0xff]  ;;  %vm111_vm1 = vcmask 244736   ;;  %vm271_vm7 = vcmask 1040384  }
  0x18   :  { %320 = vmatpush.msk.msra.mxu3 %vm115_vm0, %v101_v1  ;;  %v97_v5 = vld [vmem:[#allocation7 + $0x18] sm:$0xff]  ;;  %v109_v6 = vld [vmem:[#allocation8 + $0x30] sm:$0x3f]  ;;  %v107_v8 = vld [vmem:[#allocation8 + $0x20] sm:$0xff]  ;;  %s493_s2 = smov [#allocation11]   ;;  %s302_s19 = sshll.u32 %s551_s5, 4  ;;  %s303_s19 = int_to_ptr.hbm [resolvable:$true] %s302_s19 }
  0x19   :  { %v110_v7 = vld [vmem:[#allocation8 + $0x38] sm:$0x3f]  ;;  %184 = vmatpush.msra.mxu2 %v98_v2  ;;  %314 = vmatpush.msk.msra.mxu0 %vm115_vm0, %v109_v6  ;;  %v94_v9 = vld [vmem:[#allocation7] sm:$0xff]  ;;  %v95_v10 = vld [vmem:[#allocation7 + $0x8] sm:$0xff]  ;;  %s300_s4 = sshll.u32 %s493_s2, 4  ;;  %s301_s4 = int_to_ptr.vmem [resolvable:$true] %s300_s4 }
  0x1a   :  { %204 = vmatpush.msra.mxu3 %v99_v3  ;;  %316 = vmatpush.msk.msra.mxu1 %vm115_vm0, %v110_v7  ;;  %v108_v11 = vld [vmem:[#allocation8 + $0x28] sm:$0xff]  ;;  %v93_v12 = vld [vmem:[#allocation2] sm:$0xff]  ;;  %v106_v14 = vld [vmem:[#allocation8 + $0x18] sm:$0xff] }
  0x1b   :  { %185 = vmatpush.msra.mxu2 %v96_v4  ;;  %135 = vmatpush.msra.mxu0 %v107_v8  ;;  %v105_v13 = vld [vmem:[#allocation8 + $0x10] sm:$0xff]  ;;  %v103_v15 = vld [vmem:[#allocation8] sm:$0xff]  ;;  %v104_v16 = vld [vmem:[#allocation8 + $0x8] sm:$0xff] }
  0x1c   :  { %205 = vmatpush.msra.mxu3 %v97_v5  ;;  %155 = vmatpush.msra.mxu1 %v108_v11  ;;  %v102_v17 = vld [vmem:[#allocation5] sm:$0xff]  ;;  %v243_v7 = vld [vmem:[#allocation10] ss:$2 sm:$0x3] }
  0x1d   :  { %186 = vmatpush.msra.mxu2 %v94_v9  ;;  %136 = vmatpush.msra.mxu0 %v105_v13 }
  0x1e   :  { %206 = vmatpush.msra.mxu3 %v95_v10  ;;  %319 = vmatmul.msk.f32.vlgmr.msra.gmra.mxu2 %vm111_vm1, %v93_v12  ;;  %v245_v10 = vld [vmem:[#allocation10 + $0x1] ss:$2 sm:$0x3] }
  0x1f   :  { %321 = vmatmul.msk.f32.vlgmr.msra.gmra.mxu3 %vm111_vm1, %v93_v12  ;;  %156 = vmatpush.msra.mxu1 %v106_v14 }
  0x20   :  { %137 = vmatpush.msra.mxu0 %v103_v15  ;;  %v284_v15 = vperm.slane %v245_v10, 1 }
  0x21   :  { %157 = vmatpush.msra.mxu1 %v104_v16  ;;  %315 = vmatmul.msk.f32.vlgmr.msra.gmra.mxu0 %vm111_vm1, %v102_v17  ;;  %v283_v16 = vperm.slane %v245_v10, 0 }
  0x22   :  { %317 = vmatmul.msk.f32.vlgmr.msra.gmra.mxu1 %vm111_vm1, %v102_v17 }
  0x9e   :  { %v139_v18 = vpop.f32.mrf.mxu0 }
  0x9f   :  { %v159_v19 = vpop.f32.mrf.mxu1 }
  0xa1   :  { %v188_v20 = vpop.f32.mrf.mxu2 }
  0xa2   :  { %v208_v21 = vpop.f32.mrf.mxu3  ;;  %v189_v22 = vadd.f32 %v188_v20, %v139_v18 }
  0xa3   :  { %v209_v23 = vadd.f32 %v208_v21, %v159_v19 }
  0xa4   :  { %v211_v24 = vrot.slane %v189_v22, 4 }
  0xa5   :  { %v217_v25 = vrot.slane %v209_v23, 4 }
  0xa6   :  { %v212_v26 = vadd.f32 %v211_v24, %v189_v22 }
  0xa7   :  { %v218_v27 = vadd.f32 %v217_v25, %v209_v23 }
  0xa8   :  { %v213_v28 = vrot.slane %v212_v26, 2 }
  0xa9   :  { %v219_v29 = vrot.slane %v218_v27, 2 }
  0xaa   :  { %v214_v30 = vadd.f32 %v213_v28, %v212_v26 }
  0xab   :  { %v220_v31 = vadd.f32 %v219_v29, %v218_v27 }
  0xac   :  { %v215_v32 = vrot.slane %v214_v30, 1 }
  0xad   :  { %v221_v33 = vrot.slane %v220_v31, 1 }
  0xae   :  { %v216_v34 = vadd.f32 %v215_v32, %v214_v30 }
  0xaf   :  { %v222_v35 = vadd.f32 %v221_v33, %v220_v31 }
  0xb0   :  { %v223_v36 = vmul.f32 0.125, %v216_v34 }
  0xb1   :  { %v224_v37 = vmul.f32 0.125, %v222_v35 }
  0xb2   :  { %v225_v38 = vsub.f32 %v189_v22, %v223_v36 }
  0xb3   :  { %v226_v39 = vsub.f32 %v209_v23, %v224_v37 }
  0xb4   :  { %v227_v40 = vmul.f32 %v225_v38, %v225_v38 }
  0xb5   :  { %v228_v41 = vmul.f32 %v226_v39, %v226_v39 }
  0xb6   :  { %v229_v42 = vrot.slane %v227_v40, 4 }
  0xb7   :  { %v235_v43 = vrot.slane %v228_v41, 4 }
  0xb8   :  { %v230_v44 = vadd.f32 %v229_v42, %v227_v40 }
  0xb9   :  { %v236_v45 = vadd.f32 %v235_v43, %v228_v41 }
  0xba   :  { %v231_v46 = vrot.slane %v230_v44, 2 }
  0xbb   :  { %v237_v47 = vrot.slane %v236_v45, 2 }
  0xbc   :  { %v232_v48 = vadd.f32 %v231_v46, %v230_v44 }
  0xbd   :  { %v238_v49 = vadd.f32 %v237_v47, %v236_v45 }
  0xbe   :  { %v233_v50 = vrot.slane %v232_v48, 1 }
  0xbf   :  { %v239_v51 = vrot.slane %v238_v49, 1 }
  0xc0   :  { %v234_v52 = vadd.f32 %v233_v50, %v232_v48 }
  0xc1   :  { %v240_v53 = vadd.f32 %v239_v51, %v238_v49 }
  0xc2   :  { %v241_v54 = vmul.f32 0.125, %v234_v52 }
  0xc3   :  { %v242_v55 = vmul.f32 0.125, %v240_v53 }
  0xc4   :  { %v246_v56 = vadd.f32 1e-05, %v241_v54 }
  0xc5   :  { %v247_v57 = vadd.f32 1e-05, %v242_v55 }
  0xc6   :  { %330 = vrsqrt.f32 %v246_v56  ;;  %vm254_vm6 = vweird.f32 %v246_v56 }
  0xc7   :  { %332 = vrsqrt.f32 %v247_v57  ;;  %vm264_vm4 = vweird.f32 %v247_v57 }
  0xcc   :  { %v331_v58 = vpop.eup %330 }
  0xcd   :  { %v333_v59 = vpop.eup %332  ;;  %v249_v60 = vmul.f32 %v331_v58, %v246_v56  ;;  %vm255_vm3 = vweird.f32 %v331_v58 }
  0xce   :  { %v259_v61 = vmul.f32 %v333_v59, %v247_v57  ;;  %vm265_vm2 = vweird.f32 %v333_v59  ;;  %vm256_vm8 = vmor %vm254_vm6, %vm255_vm3 }
  0xcf   :  { %v250_v62 = vmul.f32 %v331_v58, %v249_v60  ;;  %vm266_vm5 = vmor %vm264_vm4, %vm265_vm2 }
  0xd0   :  { %v260_v63 = vmul.f32 %v333_v59, %v259_v61 }
  0xd1   :  { %v251_v0 = vmul.f32 0.5, %v250_v62 }
  0xd2   :  { %v261_v1 = vmul.f32 0.5, %v260_v63 }
  0xd3   :  { %v252_v2 = vsub.f32 1.5, %v251_v0 }
  0xd4   :  { %v262_v3 = vsub.f32 1.5, %v261_v1 }
  0xd5   :  { %v253_v4 = vmul.f32 %v331_v58, %v252_v2 }
  0xd6   :  { %v263_v5 = vmul.f32 %v333_v59, %v262_v3 }
  0xd7   :  { %v257_v9 = vsel %vm256_vm8, %v331_v58, %v253_v4 }
  0xd8   :  { %v267_v6 = vsel %vm266_vm5, %v333_v59, %v263_v5 }
  0xd9   :  { %v270_v8 = vrot.slane %v267_v6, 7 }
  0xdb   :  { %v272_v11 = vsel %vm271_vm7, %v257_v9, %v270_v8 }
  0xdc   :  { %v274_v12 = vmul.f32 %v272_v11, %v243_v7 }
  0xde   :  { %v276_v13 = vperm.slane %v274_v12, 0  ;;  %v277_v14 = vperm.slane %v274_v12, 1 }
  0xe0   :  { %v281_v17 = vmul.f32 %v277_v14, %v226_v39  ;;  %v280_v18 = vmul.f32 %v276_v13, %v225_v38 }
  0xe2   :  { %v288_v19 = vadd.f32 %v284_v15, %v281_v17  ;;  %v287_v20 = vadd.f32 %v283_v16, %v280_v18 }
  0xe4   :  { %v289_v21 = vmul.f32 0.25, %v287_v20  ;;  %v290_v22 = vmul.f32 0.25, %v288_v19 }
  0xe6   :  { %v291_v23 = vmax.f32 %v287_v20, %v289_v21  ;;  %v292_v24 = vmax.f32 %v288_v19, %v290_v22 }
  0xe8   :  { %293 = vst [vmem:[#allocation11] sm:$0xff] %v291_v23 }
  0xe9   :  { %294 = vst [vmem:[#allocation11 + $0x8] sm:$0xff] %v292_v24 }
  0xea   :  { %305 = dma.vmem_to_hbm [thread:$0]  %s301_s4, 256, %s303_s19, [#allocation4]  }
  0xeb   :  { %484 = dma.done.wait [#allocation4], 256  }
  0xec   :  { %485 = vsyncadd [#allocation4], 4294967040 }
  0xed   :  { %310 = vsyncpa [#allocation3], 1 }
  0xee   :  { %311 = vsyncpa [#allocation6], 1 }
  0xef   :  { %312 = vsyncpa [#allocation9], 1 }
  0xf0   :  { %313 = vsyncpa [#allocation4], 1 }

</bundles_post_ra>
